<compile_context>
chip_gen: v6e
topology: v6e:2x2x1
jax: 0.10.0
libtpu: 0.0.40
codegen_flags: <defaults>
</compile_context>

<pallas_src>
import functools

import jax
import jax.numpy as jnp
from jax.experimental import pallas as pl
from jax.experimental.pallas import tpu as pltpu

NEURONS = 50
DEGREE = 3


def e1net_kernel(xt_ref, w1_ref, b1_ref, w2_ref, b2_ref, w3_ref, b3_ref,
                 w4_ref, b4_ref, out_ref, *, degree):
    xt = xt_ref[...]                                     # (2, T), batch on lanes
    x_row = xt[0:1, :]                                   # (1, T)
    t_row = xt[1:2, :]                                   # (1, T)

    # Layer 1 (K=2): two VPU broadcast-FMAs; skip the MXU for a depth-2 contraction.
    w1 = w1_ref[...]                                     # (50, 2)
    h1 = jnp.tanh(w1[:, 0:1] * x_row + w1[:, 1:2] * t_row + b1_ref[...])   # (50, T)

    # Layers 2/3: MXU matmuls; batch tile is the (lane-dense) output dimension.
    h2 = jnp.tanh(jnp.dot(w2_ref[...], h1,
                          preferred_element_type=jnp.float32) + b2_ref[...])
    h3 = jnp.tanh(jnp.dot(w3_ref[...], h2,
                          preferred_element_type=jnp.float32) + b3_ref[...])

    # Output layer; rows pre-permuted to [H1_0 | sin_amp | freq | cos_amp].
    H1 = (jnp.dot(w4_ref[...], h3,
                  preferred_element_type=jnp.float32) + b4_ref[...])        # (3d+1, T)

    h1_0 = H1[0:1, :]                                    # (1, T)
    sin_amp = H1[1:1 + degree, :]                        # (d, T)
    freq = H1[1 + degree:1 + 2 * degree, :]              # (d, T)
    cos_amp = H1[1 + 2 * degree:1 + 3 * degree, :]       # (d, T)

    # Vectorized degree epilogue: one sin + one cos on (degree, T) blocks.
    phase = freq * x_row                                 # (d, T)
    terms = sin_amp * jnp.sin(phase) + cos_amp * jnp.cos(phase)
    total = h1_0 + jnp.sum(terms, axis=0, keepdims=True)  # (1, T)

    out_ref[...] = total * (1.0 / float(degree + 1))     # lane-dense store


def e1net_forward(x, t, params, *, degree=DEGREE, block_rows=512):
    """x, t: (N, 1) float32. params in PyTorch layout: w (out, in), b (out,).

    Returns (N, 1) float32.
    """
    assert block_rows % 128 == 0, "batch tile must be lane-aligned (multiple of 128)"
    (w1, b1), (w2, b2), (w3, b3), (w4, b4) = params
    n = x.shape[0]
    num_tiles = pl.cdiv(n, block_rows)
    n_pad = num_tiles * block_rows

    # Feature-major inputs: (2, n_pad), batch on the lane axis; zero-pad the tail.
    xt = jnp.concatenate([x, t], axis=1).T
    xt = jnp.pad(xt, ((0, 0), (0, n_pad - n)))

    # Permute output-layer rows so the in-kernel epilogue slices are contiguous:
    #   [feature 0 | sin amps (1+3k) | freqs (2+3k) | cos amps (3+3k)]
    perm = ([0]
            + [1 + 3 * k for k in range(degree)]
            + [2 + 3 * k for k in range(degree)]
            + [3 + 3 * k for k in range(degree)])
    perm = jnp.asarray(perm, jnp.int32)
    w4r = w4[perm, :]
    b4r = b4[perm]

    col = lambda b: b.reshape(-1, 1)                     # bias as (out, 1) column
    weights = (w1, col(b1), w2, col(b2), w3, col(b3), w4r, col(b4r))

    def resident_spec(a):
        # Full-array block, constant index map -> stays VMEM-resident across grid.
        return pl.BlockSpec(a.shape, lambda i: (0, 0))

    kernel = functools.partial(e1net_kernel, degree=degree)

    # Advisory cost estimate (per padded row).
    flops = n_pad * (4 * NEURONS                          # layer-1 FMAs
                     + 2 * 2 * NEURONS * NEURONS          # layers 2 & 3
                     + 2 * NEURONS * (3 * degree + 1)     # output layer
                     + 8 * degree)                        # epilogue muls/adds
    transcendentals = n_pad * (3 * NEURONS + 2 * degree)
    bytes_accessed = (xt.size + n_pad) * 4 + sum(int(w.size) for w in weights) * 4

    out = pl.pallas_call(
        kernel,
        out_shape=jax.ShapeDtypeStruct((1, n_pad), jnp.float32),
        grid_spec=pltpu.PrefetchScalarGridSpec(
            num_scalar_prefetch=0,
            grid=(num_tiles,),
            in_specs=[pl.BlockSpec((2, block_rows), lambda i: (0, i))]
                     + [resident_spec(a) for a in weights],
            out_specs=pl.BlockSpec((1, block_rows), lambda i: (0, i)),
        ),
        compiler_params=pltpu.CompilerParams(
            dimension_semantics=("parallel",),           # shard batch across TCs on v7x
            vmem_limit_bytes=32 * 1024 * 1024,           # explicit, safe on v5e/v6e/v7x
        ),
        cost_estimate=pl.CostEstimate(
            flops=flops,
            transcendentals=transcendentals,
            bytes_accessed=bytes_accessed),
    )(xt, *weights)

    return out[0, :n].reshape(n, 1)


def make_params(key, degree=DEGREE, neurons=NEURONS):
    """PyTorch-convention params: weight (out, in) xavier-uniform, bias (out,)."""
    dims = [(2, neurons), (neurons, neurons), (neurons, neurons),
            (neurons, 3 * degree + 1)]
    params = []
    for fan_in, fan_out in dims:
        key, kw, kb = jax.random.split(key, 3)
        limit = (6.0 / (fan_in + fan_out)) ** 0.5
        w = jax.random.uniform(kw, (fan_out, fan_in), jnp.float32,
                               minval=-limit, maxval=limit)
        bound = 1.0 / (fan_in ** 0.5)
        b = jax.random.uniform(kb, (fan_out,), jnp.float32,
                               minval=-bound, maxval=bound)
        params.append((w, b))
    return params


def reference_forward(x, t, params, degree=DEGREE):
    """Pure-JAX reference mirroring the PyTorch forward, for verification."""
    (w1, b1), (w2, b2), (w3, b3), (w4, b4) = params
    hi = jax.lax.Precision.HIGHEST
    inputs = jnp.concatenate([x, t], axis=1)
    h1 = jnp.tanh(jnp.dot(inputs, w1.T, precision=hi) + b1)
    h2 = jnp.tanh(jnp.dot(h1, w2.T, precision=hi) + b2)
    h3 = jnp.tanh(jnp.dot(h2, w3.T, precision=hi) + b3)
    H1 = jnp.dot(h3, w4.T, precision=hi) + b4
    H1_0 = H1[:, 0:1]
    sc = H1[:, 1:].reshape(-1, degree, 3)
    sin_amp, freq, cos_amp = sc[:, :, 0], sc[:, :, 1], sc[:, :, 2]
    sin_terms = sin_amp * jnp.sin(freq * x)
    cos_terms = cos_amp * jnp.cos(freq * x)
    sin_cos_sum = (sin_terms + cos_terms).sum(axis=1, keepdims=True)
    return (H1_0 + sin_cos_sum) / float(degree + 1)


if __name__ == "__main__":
    key = jax.random.PRNGKey(0)
    kp, kx, kt = jax.random.split(key, 3)

    params = make_params(kp)

    # Small demo batch; 300 rows with a 128-row tile exercises a multi-step
    # grid plus tail padding (300 -> 384).
    N = 300
    x = jax.random.uniform(kx, (N, 1), jnp.float32)
    t = jax.random.uniform(kt, (N, 1), jnp.float32)

    out = e1net_forward(x, t, params, block_rows=128)
    out = jax.block_until_ready(out)

    ref = reference_forward(x, t, params)
    assert out.shape == (N, 1)
    assert jnp.allclose(out, ref, atol=1e-4, rtol=1e-4), (out[:4], ref[:4])

    print("KERNEL_OK")
</pallas_src>

<mosaic_0001>
module attributes {stable_mosaic.version = 11 : i64} {
  func.func @e1net_kernel(%arg0: i32, %arg1: memref<2x128xf32, #tpu.memory_space<vmem>>, %arg2: memref<50x2xf32, #tpu.memory_space<vmem>>, %arg3: memref<50x1xf32, #tpu.memory_space<vmem>>, %arg4: memref<50x50xf32, #tpu.memory_space<vmem>>, %arg5: memref<50x1xf32, #tpu.memory_space<vmem>>, %arg6: memref<50x50xf32, #tpu.memory_space<vmem>>, %arg7: memref<50x1xf32, #tpu.memory_space<vmem>>, %arg8: memref<10x50xf32, #tpu.memory_space<vmem>>, %arg9: memref<10x1xf32, #tpu.memory_space<vmem>>, %arg10: memref<1x128xf32, #tpu.memory_space<vmem>>) attributes {dimension_semantics = [#tpu.dimension_semantics<parallel>], iteration_bounds = array<i64: 3>, scalar_prefetch = 0 : i64, scratch_operands = 0 : i64, tpu.core_type = #tpu.core_type<tc>, window_params = [{transform_indices = @transform_0, window_bounds = array<i64: 2, 128>}, {pipeline_mode = #tpu.pipeline_mode<synchronous>, transform_indices = @transform_1, window_bounds = array<i64: 50, 2>}, {pipeline_mode = #tpu.pipeline_mode<synchronous>, transform_indices = @transform_2, window_bounds = array<i64: 50, 1>}, {pipeline_mode = #tpu.pipeline_mode<synchronous>, transform_indices = @transform_3, window_bounds = array<i64: 50, 50>}, {pipeline_mode = #tpu.pipeline_mode<synchronous>, transform_indices = @transform_4, window_bounds = array<i64: 50, 1>}, {pipeline_mode = #tpu.pipeline_mode<synchronous>, transform_indices = @transform_5, window_bounds = array<i64: 50, 50>}, {pipeline_mode = #tpu.pipeline_mode<synchronous>, transform_indices = @transform_6, window_bounds = array<i64: 50, 1>}, {pipeline_mode = #tpu.pipeline_mode<synchronous>, transform_indices = @transform_7, window_bounds = array<i64: 10, 50>}, {pipeline_mode = #tpu.pipeline_mode<synchronous>, transform_indices = @transform_8, window_bounds = array<i64: 10, 1>}, {transform_indices = @transform_9, window_bounds = array<i64: 1, 128>}]} {
    %c0 = arith.constant 0 : index
    %c0_0 = arith.constant 0 : index
    %0 = vector.load %arg1[%c0, %c0_0] : memref<2x128xf32, #tpu.memory_space<vmem>>, vector<2x128xf32>
    %1 = vector.extract_strided_slice %0 {offsets = [0, 0], sizes = [1, 128], strides = [1, 1]} : vector<2x128xf32> to vector<1x128xf32>
    %2 = vector.extract_strided_slice %0 {offsets = [1, 0], sizes = [1, 128], strides = [1, 1]} : vector<2x128xf32> to vector<1x128xf32>
    %c0_1 = arith.constant 0 : index
    %c0_2 = arith.constant 0 : index
    %3 = vector.load %arg2[%c0_1, %c0_2] : memref<50x2xf32, #tpu.memory_space<vmem>>, vector<50x2xf32>
    %4 = vector.extract_strided_slice %3 {offsets = [0, 0], sizes = [50, 1], strides = [1, 1]} : vector<50x2xf32> to vector<50x1xf32>
    %5 = vector.broadcast %4 : vector<50x1xf32> to vector<50x128xf32>
    %6 = vector.broadcast %1 : vector<1x128xf32> to vector<50x128xf32>
    %7 = arith.mulf %5, %6 : vector<50x128xf32>
    %8 = vector.extract_strided_slice %3 {offsets = [0, 1], sizes = [50, 1], strides = [1, 1]} : vector<50x2xf32> to vector<50x1xf32>
    %9 = vector.broadcast %8 : vector<50x1xf32> to vector<50x128xf32>
    %10 = vector.broadcast %2 : vector<1x128xf32> to vector<50x128xf32>
    %11 = arith.mulf %9, %10 : vector<50x128xf32>
    %12 = arith.addf %7, %11 : vector<50x128xf32>
    %c0_3 = arith.constant 0 : index
    %c0_4 = arith.constant 0 : index
    %13 = vector.load %arg3[%c0_3, %c0_4] : memref<50x1xf32, #tpu.memory_space<vmem>>, vector<50x1xf32>
    %14 = vector.broadcast %13 : vector<50x1xf32> to vector<50x128xf32>
    %15 = arith.addf %12, %14 : vector<50x128xf32>
    %16 = math.tanh %15 : vector<50x128xf32>
    %c0_5 = arith.constant 0 : index
    %c0_6 = arith.constant 0 : index
    %17 = vector.load %arg4[%c0_5, %c0_6] : memref<50x50xf32, #tpu.memory_space<vmem>>, vector<50x50xf32>
    %cst = arith.constant dense<0.000000e+00> : vector<50x128xf32>
    %18 = tpu.matmul %17, %16, %cst {dimension_numbers = #tpu.dot_dimension_numbers<[1], [0], [0], [1], [0, 0, 1, 1], [], []>} : vector<50x50xf32>, vector<50x128xf32>, vector<50x128xf32> -> vector<50x128xf32>
    %c0_7 = arith.constant 0 : index
    %c0_8 = arith.constant 0 : index
    %19 = vector.load %arg5[%c0_7, %c0_8] : memref<50x1xf32, #tpu.memory_space<vmem>>, vector<50x1xf32>
    %20 = vector.broadcast %19 : vector<50x1xf32> to vector<50x128xf32>
    %21 = arith.addf %18, %20 : vector<50x128xf32>
    %22 = math.tanh %21 : vector<50x128xf32>
    %c0_9 = arith.constant 0 : index
    %c0_10 = arith.constant 0 : index
    %23 = vector.load %arg6[%c0_9, %c0_10] : memref<50x50xf32, #tpu.memory_space<vmem>>, vector<50x50xf32>
    %cst_11 = arith.constant dense<0.000000e+00> : vector<50x128xf32>
    %24 = tpu.matmul %23, %22, %cst_11 {dimension_numbers = #tpu.dot_dimension_numbers<[1], [0], [0], [1], [0, 0, 1, 1], [], []>} : vector<50x50xf32>, vector<50x128xf32>, vector<50x128xf32> -> vector<50x128xf32>
    %c0_12 = arith.constant 0 : index
    %c0_13 = arith.constant 0 : index
    %25 = vector.load %arg7[%c0_12, %c0_13] : memref<50x1xf32, #tpu.memory_space<vmem>>, vector<50x1xf32>
    %26 = vector.broadcast %25 : vector<50x1xf32> to vector<50x128xf32>
    %27 = arith.addf %24, %26 : vector<50x128xf32>
    %28 = math.tanh %27 : vector<50x128xf32>
    %c0_14 = arith.constant 0 : index
    %c0_15 = arith.constant 0 : index
    %29 = vector.load %arg8[%c0_14, %c0_15] : memref<10x50xf32, #tpu.memory_space<vmem>>, vector<10x50xf32>
    %cst_16 = arith.constant dense<0.000000e+00> : vector<10x128xf32>
    %30 = tpu.matmul %29, %28, %cst_16 {dimension_numbers = #tpu.dot_dimension_numbers<[1], [0], [0], [1], [0, 0, 1, 1], [], []>} : vector<10x50xf32>, vector<50x128xf32>, vector<10x128xf32> -> vector<10x128xf32>
    %c0_17 = arith.constant 0 : index
    %c0_18 = arith.constant 0 : index
    %31 = vector.load %arg9[%c0_17, %c0_18] : memref<10x1xf32, #tpu.memory_space<vmem>>, vector<10x1xf32>
    %32 = vector.broadcast %31 : vector<10x1xf32> to vector<10x128xf32>
    %33 = arith.addf %30, %32 : vector<10x128xf32>
    %34 = vector.extract_strided_slice %33 {offsets = [0, 0], sizes = [1, 128], strides = [1, 1]} : vector<10x128xf32> to vector<1x128xf32>
    %35 = vector.extract_strided_slice %33 {offsets = [1, 0], sizes = [3, 128], strides = [1, 1]} : vector<10x128xf32> to vector<3x128xf32>
    %36 = vector.extract_strided_slice %33 {offsets = [4, 0], sizes = [3, 128], strides = [1, 1]} : vector<10x128xf32> to vector<3x128xf32>
    %37 = vector.extract_strided_slice %33 {offsets = [7, 0], sizes = [3, 128], strides = [1, 1]} : vector<10x128xf32> to vector<3x128xf32>
    %38 = vector.broadcast %1 : vector<1x128xf32> to vector<3x128xf32>
    %39 = arith.mulf %36, %38 : vector<3x128xf32>
    %40 = math.sin %39 : vector<3x128xf32>
    %41 = arith.mulf %35, %40 : vector<3x128xf32>
    %42 = math.cos %39 : vector<3x128xf32>
    %43 = arith.mulf %37, %42 : vector<3x128xf32>
    %44 = arith.addf %41, %43 : vector<3x128xf32>
    %cst_19 = arith.constant dense<0.000000e+00> : vector<128xf32>
    %45 = vector.multi_reduction <add>, %44, %cst_19 [0] : vector<3x128xf32> to vector<128xf32>
    %46 = vector.shape_cast %45 : vector<128xf32> to vector<1x128xf32>
    %47 = arith.addf %34, %46 : vector<1x128xf32>
    %cst_20 = arith.constant 2.500000e-01 : f32
    %48 = vector.broadcast %cst_20 : f32 to vector<1x128xf32>
    %49 = arith.mulf %47, %48 : vector<1x128xf32>
    %c0_21 = arith.constant 0 : index
    %c0_22 = arith.constant 0 : index
    %50 = vector.load %arg10[%c0_21, %c0_22] : memref<1x128xf32, #tpu.memory_space<vmem>>, vector<1x128xf32>
    tpu.vector_store %arg10[%c0_21, %c0_22], %49 {strides = array<i32>} : memref<1x128xf32, #tpu.memory_space<vmem>>, vector<1x128xf32>,
    return
  }
  func.func @transform_0(%arg0: i32) -> (i32, i32) {
    %c0_i32 = arith.constant 0 : i32
    %c0_i32_0 = arith.constant 0 : i32
    return %c0_i32, %arg0 : i32, i32
  }
  func.func @transform_1(%arg0: i32) -> (i32, i32) {
    %c0_i32 = arith.constant 0 : i32
    %c0_i32_0 = arith.constant 0 : i32
    %c0_i32_1 = arith.constant 0 : i32
    return %c0_i32, %c0_i32_0 : i32, i32
  }
  func.func @transform_2(%arg0: i32) -> (i32, i32) {
    %c0_i32 = arith.constant 0 : i32
    %c0_i32_0 = arith.constant 0 : i32
    %c0_i32_1 = arith.constant 0 : i32
    return %c0_i32, %c0_i32_0 : i32, i32
  }
  func.func @transform_3(%arg0: i32) -> (i32, i32) {
    %c0_i32 = arith.constant 0 : i32
    %c0_i32_0 = arith.constant 0 : i32
    %c0_i32_1 = arith.constant 0 : i32
    return %c0_i32, %c0_i32_0 : i32, i32
  }
  func.func @transform_4(%arg0: i32) -> (i32, i32) {
    %c0_i32 = arith.constant 0 : i32
    %c0_i32_0 = arith.constant 0 : i32
    %c0_i32_1 = arith.constant 0 : i32
    return %c0_i32, %c0_i32_0 : i32, i32
  }
  func.func @transform_5(%arg0: i32) -> (i32, i32) {
    %c0_i32 = arith.constant 0 : i32
    %c0_i32_0 = arith.constant 0 : i32
    %c0_i32_1 = arith.constant 0 : i32
    return %c0_i32, %c0_i32_0 : i32, i32
  }
  func.func @transform_6(%arg0: i32) -> (i32, i32) {
    %c0_i32 = arith.constant 0 : i32
    %c0_i32_0 = arith.constant 0 : i32
    %c0_i32_1 = arith.constant 0 : i32
    return %c0_i32, %c0_i32_0 : i32, i32
  }
  func.func @transform_7(%arg0: i32) -> (i32, i32) {
    %c0_i32 = arith.constant 0 : i32
    %c0_i32_0 = arith.constant 0 : i32
    %c0_i32_1 = arith.constant 0 : i32
    return %c0_i32, %c0_i32_0 : i32, i32
  }
  func.func @transform_8(%arg0: i32) -> (i32, i32) {
    %c0_i32 = arith.constant 0 : i32
    %c0_i32_0 = arith.constant 0 : i32
    %c0_i32_1 = arith.constant 0 : i32
    return %c0_i32, %c0_i32_0 : i32, i32
  }
  func.func @transform_9(%arg0: i32) -> (i32, i32) {
    %c0_i32 = arith.constant 0 : i32
    %c0_i32_0 = arith.constant 0 : i32
    return %c0_i32, %arg0 : i32, i32
  }
}

</mosaic_0001>

<bundles_post_ra>
// kernel: tpu_custom_call.1
= control target key start
LH: loop header
LB: loop body
LE: loop exit
PB: predicated region body
PF: predicated region fallthrough
CT: control target
= control target key end

     0   :  { %14 = vsyncpa [#allocation3], 0  ;;  %s1968_s0 = inlined_call_operand.vmem [shape: f32[2,384], index: 0, kind: input, shape index: {}]   ;;  %s1969_s1 = inlined_call_operand.vmem [shape: f32[50,2], index: 1, kind: input, shape index: {}]   ;;  %s1970_s2 = inlined_call_operand.vmem [shape: f32[50,1], index: 2, kind: input, shape index: {}]   ;;  %s1971_s3 = inlined_call_operand.vmem [shape: f32[50,50], index: 3, kind: input, shape index: {}]   ;;  %s1972_s4 = inlined_call_operand.vmem [shape: f32[50,1], index: 4, kind: input, shape index: {}]   ;;  %s1973_s5 = inlined_call_operand.vmem [shape: f32[50,50], index: 5, kind: input, shape index: {}]   ;;  %s1974_s6 = inlined_call_operand.vmem [shape: f32[50,1], index: 6, kind: input, shape index: {}]   ;;  %s1975_s7 = inlined_call_operand.vmem [shape: f32[10,50], index: 7, kind: input, shape index: {}]   ;;  %s1976_s8 = inlined_call_operand.vmem [shape: f32[10,1], index: 8, kind: input, shape index: {}]   ;;  %s1977_s9 = inlined_call_operand.hbm [shape: f32[1,384], index: 9, kind: output, shape index: {}]  }
   0x1   :  { %16 = vsyncpa [#allocation3 + $0x1], 0  ;;  %s1640_s30 = smov 0   ;;  %s1642_s10 = smov 0  }
   0x2   :  { %s1644_s11 = smov 0   ;;  %s1646_s12 = smov 0  }
   0x3 LB: > { %s1661_s13 = sadd.s32 4294967295, %s1577_s12   ;;  %s1249_s14 = sadd.s32 4294967294, %s1577_s12   ;;  %s1577_s12 = sphi %s1646_s12, %s1983_s12   ;;  %s1573_s11 = sphi %s1644_s11, %s1982_s11   ;;  %s1569_s10 = sphi %s1642_s10, %s1981_s10   ;;  %s1565_s30 = sphi %s1640_s30, %s1980_s30  }
   0x4   : > { %s1665_s15 = sadd.s32 1, %s1577_s12   ;;  %s223_s16 = sadd.s32 1, %s1573_s11 }
   0x5   : > { %s220_s17 = ssub.s32 %s1577_s12, %s1665_s15  ;;  %p233_p0 = scmp.ne.s32.totalorder %s1573_s11, %s1569_s10 }
   0x6   : > { %p221_p1 = scmp.eq.s32.totalorder %s220_s17, 0  ;;  %p234_p2 = scmp.eq.s32.totalorder %s1661_s13, 2 }
   0x7   : > { %p239_p3 = scmp.ne.s32.totalorder %s1569_s10, %s1565_s30  ;;  %p240_p4 = scmp.eq.s32.totalorder %s1249_s14, 2 }
   0x8   : > { %s1676_s18 = scalar_select %p221_p1, %s1573_s11, %s223_s16  }
   0x9   : > { %p1678_p5 = por %p234_p2, %p233_p0  ;;  %p1682_p6 = por %p240_p4, %p239_p3 }
   0xa   : > { %p1252_p7 = scmp.ge.s32.totalorder %s1577_s12, 1  ;;  %p289_p8 = scmp.lt.s32.totalorder %s1577_s12, 4 }
   0xc   : > { %p290_p9 = pnand %p1252_p7, %p289_p8 }
   0xd   : > { %p323_p10 = scmp.lt.s32.totalorder (!%p290_p9), %s1661_s13, 2  ;;  %s1281_s23 = sshll.u32 (!%p290_p9), %s1661_s13, 4 }
   0xe   : > { %293 = sbr.rel (%p290_p9) target bundleno = 1027 (0x403), region = 56  ;;  %s1192_s28 = scalar_lea.hbm (!%p290_p9), %s1977_s9, %s1281_s23 }
   0xf   : > { %s1589_s16 = smov (!%p290_p9), [#allocation2]  }
  0x10   : > { %s1521_s17 = sshll.u32 (!%p290_p9), %s1589_s16, 4  ;;  %s1522_s17 = int_to_ptr.vmem [resolvable:$false] %s1521_s17 }
  0x13   : > { %v334_v0 = vld [vmem:[%s1969_s1 + $0x30] sm:$0x3]  ;;  %v333_v1 = vld [vmem:[%s1969_s1 + $0x28] sm:$0xff]  ;;  %v1579_v2 = vmov 0   ;;  %v331_v3 = vld [vmem:[%s1969_s1 + $0x18] sm:$0xff]  ;;  %v1580_v4 = vmov 1   ;;  %v370_v35 = vlaneseq }
  0x14   : > { %1462 = vset.pattern.permute.xlu1 %v1579_v2  ;;  %1461 = vset.pattern.permute.xlu0 %v1579_v2  ;;  %v330_v5 = vld [vmem:[%s1969_s1 + $0x10] sm:$0xff]  ;;  %v332_v6 = vld [vmem:[%s1969_s1 + $0x20] sm:$0xff]  ;;  %v432_v9 = vld [vmem:[%s1970_s2 + $0x28] sm:$0xff]  ;;  %v1581_v13 = vmov 0.0   ;;  %vm1582_vm0 = vmmov 0   ;;  %s324_s21 = scalar_select %p323_p10, %s1661_s13, 2 }
  0x15   : > { %367 = vperm.xlu0 %1461, %v334_v0   ;;  %362 = vperm.xlu1 %1462, %v333_v1   ;;  %v431_v7 = vld [vmem:[%s1970_s2 + $0x20] sm:$0xff]  ;;  %v433_v8 = vld [vmem:[%s1970_s2 + $0x30] sm:$0x3]  ;;  %v329_v10 = vld [vmem:[%s1969_s1 + $0x8] sm:$0xff]  ;;  %v371_v38 = vshrl.u32 %v370_v35, 7  ;;  %vm554_vm1 = vcmask 1041408  }
  0x16   : > { %v328_v11 = vld [vmem:[%s1969_s1] sm:$0xff]  ;;  %v428_v12 = vld [vmem:[%s1970_s2 + $0x8] sm:$0xff]  ;;  %1321 = vmatprep.subr.mxu0 %v1581_v13  ;;  %1356 = vmatprep.subr.mxu1 %v1581_v13  ;;  %v430_v14 = vld [vmem:[%s1970_s2 + $0x18] sm:$0xff]  ;;  %s1253_s22 = sshll.u32 %s324_s21, 1  ;;  %vm532_vm2 = vcmask 408576   ;;  %s1523_s13 = scalar_lea.vmem %s1522_s17, 32 }
  0x17   : > { %v495_v15 = vld [vmem:[%s1972_s4 + $0x28] sm:$0xff]  ;;  %v493_v16 = vld [vmem:[%s1972_s4 + $0x18] sm:$0xff]  ;;  %v429_v18 = vld [vmem:[%s1970_s2 + $0x10] sm:$0xff]  ;;  %1335 = vmatprep.mubr.msk.f32.mxu0 %vm1582_vm0, %v1581_v13  ;;  %1370 = vmatprep.mubr.msk.f32.mxu1 %vm1582_vm0, %v1581_v13  ;;  %s326_s25 = scalar_lea.vmem %s1968_s0, %s1253_s22  ;;  %v411_v41 = vsub.s32 1, %v371_v38  ;;  %v372_v42 = vsub.s32 0, %v371_v38  ;;  %s321_s22 = sand.u32 1, %s1569_s10  }
  0x18   : > { %v491_v17 = vld [vmem:[%s1972_s4 + $0x8] sm:$0xff]  ;;  %v678_v19 = vld [vmem:[%s1974_s6 + $0x30] sm:$0x3]  ;;  %v427_v20 = vld [vmem:[%s1970_s2] sm:$0xff]  ;;  %s322_s24 = scalar_lea.vmem [#allocation2], %s321_s22  ;;  %s1182_s29 = scalar_lea.sflag [#allocation3], %s321_s22 }
  0x19   : > { %1463 = vset.pattern.permute.xlu1 %v1580_v4  ;;  %352 = vperm.xlu0 %1461, %v331_v3   ;;  %v676_v21 = vld [vmem:[%s1974_s6 + $0x20] sm:$0xff]  ;;  %v496_v22 = vld [vmem:[%s1972_s4 + $0x30] sm:$0x3]  ;;  %v848_v27 = vld [vmem:[%s1976_s8 + $0x8] sm:$0x3] }
  0x1a   : > { %402 = vperm.xlu1 %1463, %v333_v1   ;;  %v674_v23 = vld [vmem:[%s1974_s6 + $0x10] sm:$0xff]  ;;  %v494_v24 = vld [vmem:[%s1972_s4 + $0x20] sm:$0xff]  ;;  %v677_v29 = vld [vmem:[%s1974_s6 + $0x28] sm:$0xff] }
  0x1b   : > { %v672_v25 = vld [vmem:[%s1974_s6] sm:$0xff]  ;;  %v492_v26 = vld [vmem:[%s1972_s4 + $0x10] sm:$0xff]  ;;  %v675_v30 = vld [vmem:[%s1974_s6 + $0x18] sm:$0xff] }
  0x1c   : > { %v490_v28 = vld [vmem:[%s1972_s4] sm:$0xff]  ;;  %v673_v31 = vld [vmem:[%s1974_s6 + $0x8] sm:$0xff]  ;;  %v485_v35 = vld [vmem:[%s1971_s3 + $0x10] sm:$0xff] }
  0x1d   : > { %347 = vperm.xlu0 %1461, %v330_v5   ;;  %v847_v32 = vld [vmem:[%s1976_s8] sm:$0xff]  ;;  %v488_v38 = vld [vmem:[%s1971_s3 + $0x28] sm:$0xff] }
  0x1e   : > { %1464 = vset.pattern.permute.xlu1 %v1579_v2  ;;  %v327_v44 = vld [vmem:[%s326_s25] sm:$0x3]  ;;  %s1194_s25 = sshll.u32 %s322_s24, 4  ;;  %s1195_s25 = int_to_ptr.vmem [resolvable:$true] %s1194_s25 }
  0x1f   : > { %357 = vperm.xlu1 %1464, %v332_v6   ;;  %v412_v46 = vrot.slane %v327_v44, %v411_v41  ;;  %v1789_v47 = vrot.slane %v327_v44, %v372_v42  ;;  %s1517_s14 = scalar_lea.vmem %s1195_s25, 16  ;;  %p1524_p0 = scmp.lt.s32.totalorder %s1195_s25, %s1522_s17 }
  0x20   : > { %p1518_p11 = scmp.ne.s32.totalorder %s1195_s25, %s1517_s14  ;;  %p1525_p1 = scmp.lt.s32.totalorder %s1523_s13, %s1517_s14 }
  0x21   : > { %456 = vperm.xlu0 %1461, %v431_v7  }
  0x22   : > { %p1519_p12 = pnand %p1518_p11, %p1678_p5  ;;  %p1526_p2 = por %p1525_p1, %p1524_p0 }
  0x23   : > { %466 = vperm.xlu1 %1464, %v433_v8  }
  0x24   : > { %p1520_p13 = pneg %p1519_p12 }
  0x25   : > { %1468 = vset.pattern.permute.xlu0 %v1580_v4 }
  0x26   : > { %406 = vperm.xlu0 %1468, %v334_v0   ;;  %p1527_p3 = pnand %p1526_p2, %p1520_p13 }
  0x27   : > { %1465 = vset.pattern.permute.xlu1 %v1580_v4 }
  0x28   : > { %394 = vperm.xlu1 %1465, %v331_v3  }
  0x2a   : > { %398 = vperm.xlu0 %1468, %v332_v6  }
  0x2c   : > { %1466 = vset.pattern.permute.xlu1 %v1579_v2 }
  0x2d   : > { %461 = vperm.xlu1 %1466, %v432_v9  }
  0x2e   : > { %386 = vperm.xlu0 %1468, %v329_v10  }
  0x31   : > { %1467 = vset.pattern.permute.xlu1 %v1580_v4 }
  0x32   : > { %390 = vperm.xlu1 %1467, %v330_v5   ;;  %382 = vperm.xlu0 %1468, %v328_v11  }
  0x36   : > { %1469 = vset.pattern.permute.xlu1 %v1579_v2  ;;  %1470 = vset.pattern.permute.xlu0 %v1579_v2 }
  0x37   : > { %342 = vperm.xlu1 %1469, %v329_v10   ;;  %441 = vperm.xlu0 %1470, %v428_v12  }
  0x3b   : > { %451 = vperm.xlu1 %1469, %v430_v14   ;;  %524 = vperm.xlu0 %1470, %v495_v15  }
  0x3f   : > { %514 = vperm.xlu0 %1470, %v493_v16   ;;  %337 = vperm.xlu1 %1469, %v328_v11  }
  0x43   : > { %504 = vperm.xlu0 %1470, %v491_v17   ;;  %446 = vperm.xlu1 %1469, %v429_v18  }
  0x47   : > { %711 = vperm.xlu0 %1470, %v678_v19   ;;  %436 = vperm.xlu1 %1469, %v427_v20  }
  0x4b   : > { %701 = vperm.xlu0 %1470, %v676_v21   ;;  %529 = vperm.xlu1 %1469, %v496_v22  }
  0x4f   : > { %691 = vperm.xlu0 %1470, %v674_v23   ;;  %519 = vperm.xlu1 %1469, %v494_v24  }
  0x53   : > { %681 = vperm.xlu0 %1470, %v672_v25   ;;  %509 = vperm.xlu1 %1469, %v492_v26  }
  0x57   : > { %856 = vperm.xlu0 %1470, %v848_v27   ;;  %499 = vperm.xlu1 %1469, %v490_v28  }
  0x5b   : > { %706 = vperm.xlu1 %1469, %v677_v29  }
  0x5f   : > { %696 = vperm.xlu1 %1469, %v675_v30  }
  0x63   : > { %686 = vperm.xlu1 %1469, %v673_v31  }
  0x67   : > { %851 = vperm.xlu1 %1469, %v847_v32   ;;  %v483_v32 = vld [vmem:[%s1971_s3] sm:$0xff] }
  0x90   : > { %v363_v33 = vpop.permute.xlu1 %362  ;;  %v368_v34 = vpop.permute.xlu0 %367 }
  0x91   : > { %v380_v49 = vmul.f32 %v1789_v47, %v368_v34  ;;  %v379_v54 = vmul.f32 %v1789_v47, %v363_v33  ;;  %v484_v34 = vld [vmem:[%s1971_s3 + $0x8] sm:$0xff] }
  0x94   : > { %v353_v36 = vpop.permute.xlu0 %352 }
  0x95   : > { %v403_v37 = vpop.permute.xlu1 %402  ;;  %v377_v4 = vmul.f32 %v1789_v47, %v353_v36  ;;  %v486_v36 = vld [vmem:[%s1971_s3 + $0x18] sm:$0xff] }
  0x96   : > { %v418_v51 = vmul.f32 %v412_v46, %v403_v37  ;;  %v487_v37 = vld [vmem:[%s1971_s3 + $0x20] sm:$0xff] }
  0x98   : > { %v348_v39 = vpop.permute.xlu0 %347  ;;  %v425_v59 = vadd.f32 %v418_v51, %v379_v54 }
  0x99   : > { %v376_v17 = vmul.f32 %v1789_v47, %v348_v39  ;;  %v489_v39 = vld [vmem:[%s1971_s3 + $0x30] sm:$0x3] }
  0x9a   : > { %v358_v40 = vpop.permute.xlu1 %357 }
  0x9b   : > { %v378_v56 = vmul.f32 %v1789_v47, %v358_v40 }
  0x9c   : > { %v457_v43 = vpop.permute.xlu0 %456 }
  0x9e   : > { %v467_v45 = vpop.permute.xlu1 %466 }
  0xa1   : > { %v407_v48 = vpop.permute.xlu0 %406 }
  0xa2   : > { %v419_v50 = vmul.f32 %v412_v46, %v407_v48 }
  0xa3   : > { %v395_v52 = vpop.permute.xlu1 %394 }
  0xa4   : > { %v426_v53 = vadd.f32 %v419_v50, %v380_v49  ;;  %v416_v1 = vmul.f32 %v412_v46, %v395_v52 }
  0xa5   : > { %v399_v55 = vpop.permute.xlu0 %398 }
  0xa6   : > { %v475_v57 = vadd.f32 %v467_v45, %v426_v53  ;;  %v417_v58 = vmul.f32 %v412_v46, %v399_v55  ;;  %v423_v6 = vadd.f32 %v416_v1, %v377_v4 }
  0xa8   : > { %1471 = vtanh.f32 %v475_v57  ;;  %v424_v60 = vadd.f32 %v417_v58, %v378_v56  ;;  %v462_v61 = vpop.permute.xlu1 %461 }
  0xa9   : > { %v474_v62 = vadd.f32 %v462_v61, %v425_v59  ;;  %v387_v2 = vpop.permute.xlu0 %386 }
  0xaa   : > { %v473_v63 = vadd.f32 %v457_v43, %v424_v60  ;;  %v414_v14 = vmul.f32 %v412_v46, %v387_v2 }
  0xab   : > { %1473 = vtanh.f32 %v474_v62 }
  0xac   : > { %1475 = vtanh.f32 %v473_v63 }
  0xad   : > { %v391_v0 = vpop.permute.xlu1 %390  ;;  %v383_v11 = vpop.permute.xlu0 %382 }
  0xae   : > { %v415_v15 = vmul.f32 %v412_v46, %v391_v0  ;;  %v413_v23 = vmul.f32 %v412_v46, %v383_v11  ;;  %v665_v11 = vld [vmem:[%s1973_s5] sm:$0xff] }
  0xb0   : > { %v422_v20 = vadd.f32 %v415_v15, %v376_v17  ;;  %v667_v15 = vld [vmem:[%s1973_s5 + $0x10] sm:$0xff]  ;;  %v669_v17 = vld [vmem:[%s1973_s5 + $0x20] sm:$0xff] }
  0xb2   : > { %v343_v3 = vpop.permute.xlu1 %342  ;;  %v442_v21 = vpop.permute.xlu0 %441 }
  0xb3   : > { %v375_v8 = vmul.f32 %v1789_v47, %v343_v3 }
  0xb5   : > { %v1472_v5 = vpop.eup %1471  ;;  %v421_v18 = vadd.f32 %v414_v14, %v375_v8  ;;  %v666_v14 = vld [vmem:[%s1973_s5 + $0x8] sm:$0xff] }
  0xb6   : > { %v452_v7 = vpop.permute.xlu1 %451  ;;  %1322 = vmatpush3.msk.msra.mxu0 %vm554_vm1, %v1472_v5  ;;  %v525_v52 = vpop.permute.xlu0 %524 }
  0xb7   : > { %v472_v9 = vadd.f32 %v452_v7, %v423_v6  ;;  %1323 = vmatprep.subr.mxu0 %v1581_v13  ;;  %v470_v24 = vadd.f32 %v442_v21, %v421_v18  ;;  %v670_v18 = vld [vmem:[%s1973_s5 + $0x28] sm:$0xff] }
  0xb8   : > { %v1474_v10 = vpop.eup %1473 }
  0xb9   : > { %v1476_v12 = vpop.eup %1475  ;;  %1324 = vmatpush3.msra.mxu0 %v1474_v10  ;;  %1477 = vtanh.f32 %v472_v9 }
  0xba   : > { %v338_v16 = vpop.permute.xlu1 %337  ;;  %1325 = vmatprep.subr.mxu0 %v1581_v13  ;;  %v515_v59 = vpop.permute.xlu0 %514 }
  0xbb   : > { %1326 = vmatpush3.msra.mxu0 %v1476_v12  ;;  %v374_v19 = vmul.f32 %v1789_v47, %v338_v16  ;;  %v668_v16 = vld [vmem:[%s1973_s5 + $0x18] sm:$0xff] }
  0xbc   : > { %1327 = vmatprep.subr.mxu0 %v1581_v13 }
  0xbd   : > { %v420_v26 = vadd.f32 %v413_v23, %v374_v19  ;;  %v671_v19 = vld [vmem:[%s1973_s5 + $0x30] sm:$0x3] }
  0xbe   : > { %v447_v22 = vpop.permute.xlu1 %446  ;;  %v505_v1 = vpop.permute.xlu0 %504 }
  0xbf   : > { %v471_v25 = vadd.f32 %v447_v22, %v422_v20  ;;  %v845_v20 = vld [vmem:[%s1975_s7] sm:$0xff] }
  0xc1   : > { %1479 = vtanh.f32 %v471_v25 }
  0xc2   : > { %v437_v27 = vpop.permute.xlu1 %436  ;;  %1481 = vtanh.f32 %v470_v24 }
  0xc3   : > { %v469_v28 = vadd.f32 %v437_v27, %v420_v26 }
  0xc5   : > { %1483 = vtanh.f32 %v469_v28  ;;  %v712_v28 = vpop.permute.xlu0 %711 }
  0xc6   : > { %v1478_v29 = vpop.eup %1477  ;;  %v530_v49 = vpop.permute.xlu1 %529 }
  0xc7   : > { %1328 = vmatpush3.msra.mxu0 %v1478_v29 }
  0xc8   : > { %1329 = vmatprep.subr.mxu0 %v1581_v13 }
  0xca   : > { %v520_v54 = vpop.permute.xlu1 %519 }
  0xce   : > { %v1480_v30 = vpop.eup %1479  ;;  %v510_v62 = vpop.permute.xlu1 %509 }
  0xcf   : > { %1330 = vmatpush3.msra.mxu0 %v1480_v30  ;;  %v1482_v31 = vpop.eup %1481 }
  0xd0   : > { %1331 = vmatprep.subr.mxu0 %v1581_v13 }
  0xd1   : > { %1332 = vmatpush3.msra.mxu0 %v1482_v31 }
  0xd2   : > { %v1484_v33 = vpop.eup %1483  ;;  %1333 = vmatprep.subr.mxu0 %v1581_v13  ;;  %v500_v3 = vpop.permute.xlu1 %499 }
  0xd3   : > { %1334 = vmatpush3.msra.mxu0 %v1484_v33  ;;  %v702_v33 = vpop.permute.xlu0 %701 }
  0xd4   : > { %1336 = vmatmul.mubr.msk.f32.vlgmr.msra.gmra.mxu0 %vm532_vm2, %v483_v32 }
  0xd5   : > { %1338 = vmatprep.mubr.msk.f32.mxu0 %vm1582_vm0, %v1581_v13 }
  0xd6   : > { %v707_v31 = vpop.permute.xlu1 %706 }
  0xd8   : > { %1339 = vmatmul.mubr.msk.f32.gmra.mxu0 %vm532_vm2, %v484_v34 }
  0xd9   : > { %1341 = vmatprep.mubr.msk.f32.mxu0 %vm1582_vm0, %v1581_v13 }
  0xdc   : > { %1342 = vmatmul.mubr.msk.f32.gmra.mxu0 %vm532_vm2, %v485_v35 }
  0xdd   : > { %1344 = vmatprep.mubr.msk.f32.mxu0 %vm1582_vm0, %v1581_v13 }
  0xe0   : > { %1345 = vmatmul.mubr.msk.f32.gmra.mxu0 %vm532_vm2, %v486_v36 }
  0xe1   : > { %1347 = vmatprep.mubr.msk.f32.mxu0 %vm1582_vm0, %v1581_v13 }
  0xe4   : > { %1348 = vmatmul.mubr.msk.f32.gmra.mxu0 %vm532_vm2, %v487_v37 }
  0xe5   : > { %1350 = vmatprep.mubr.msk.f32.mxu0 %vm1582_vm0, %v1581_v13 }
  0xe8   : > { %1351 = vmatmul.mubr.msk.f32.gmra.mxu0 %vm532_vm2, %v488_v38  ;;  %v697_v38 = vpop.permute.xlu1 %696 }
  0xe9   : > { %1353 = vmatprep.mubr.msk.f32.mxu0 %vm1582_vm0, %v1581_v13 }
  0xec   : > { %1354 = vmatmul.mubr.msk.f32.gmra.mxu0 %vm532_vm2, %v489_v39 }
  0xed   : > { %1405 = vmatprep.mubr.msk.f32.mxu0 %vm532_vm2, %v845_v20 }
 0x194   : > { %v624_v40 = vpop.f32.mrf.mxu0 }
 0x195   : > { %v625_v4 = vadd.f32 %v624_v40, %v500_v3 }
 0x196   : > { %v1337_v41 = vpop.f32.mrf.mxu0 }
 0x197   : > { %v692_v41 = vpop.permute.xlu0 %691 }
 0x198   : > { %v629_v42 = vpop.f32.mrf.mxu0 }
 0x199   : > { %v630_v2 = vadd.f32 %v629_v42, %v505_v1 }
 0x19a   : > { %v1340_v43 = vpop.f32.mrf.mxu0 }
 0x19c   : > { %v634_v44 = vpop.f32.mrf.mxu0 }
 0x19d   : > { %v635_v0 = vadd.f32 %v634_v44, %v510_v62  ;;  %v687_v44 = vpop.permute.xlu1 %686 }
 0x19e   : > { %v1343_v45 = vpop.f32.mrf.mxu0 }
 0x1a0   : > { %v639_v46 = vpop.f32.mrf.mxu0 }
 0x1a1   : > { %v640_v63 = vadd.f32 %v639_v46, %v515_v59  ;;  %v682_v46 = vpop.permute.xlu0 %681 }
 0x1a2   : > { %v1346_v48 = vpop.f32.mrf.mxu0 }
 0x1a4   : > { %v644_v50 = vpop.f32.mrf.mxu0 }
 0x1a5   : > { %v645_v61 = vadd.f32 %v644_v50, %v520_v54 }
 0x1a6   : > { %v1349_v51 = vpop.f32.mrf.mxu0 }
 0x1a8   : > { %v649_v53 = vpop.f32.mrf.mxu0 }
 0x1a9   : > { %v650_v57 = vadd.f32 %v649_v53, %v525_v52 }
 0x1aa   : > { %v1352_v55 = vpop.f32.mrf.mxu0 }
 0x1ac   : > { %v654_v56 = vpop.f32.mrf.mxu0 }
 0x1ad   : > { %v655_v58 = vadd.f32 %v654_v56, %v530_v49  ;;  %v846_v56 = vld [vmem:[%s1975_s7 + $0x8] sm:$0x3] }
 0x1ae   : > { %v1355_v60 = vpop.f32.mrf.mxu0 }
 0x1af   : > { %1485 = vtanh.f32 %v655_v58  ;;  %v852_v58 = vpop.permute.xlu1 %851 }
 0x1b0   : > { %1487 = vtanh.f32 %v650_v57 }
 0x1b1   : > { %1489 = vtanh.f32 %v645_v61 }
 0x1b2   : > { %1491 = vtanh.f32 %v640_v63 }
 0x1b3   : > { %1493 = vtanh.f32 %v635_v0 }
 0x1b4   : > { %1495 = vtanh.f32 %v630_v2 }
 0x1b5   : > { %1497 = vtanh.f32 %v625_v4 }
 0x1bc   : > { %v1486_v5 = vpop.eup %1485 }
 0x1bd   : > { %1357 = vmatpush3.msk.msra.mxu1 %vm554_vm1, %v1486_v5  ;;  %v1488_v6 = vpop.eup %1487 }
 0x1be   : > { %1358 = vmatprep.subr.mxu1 %v1581_v13  ;;  %v1490_v7 = vpop.eup %1489 }
 0x1bf   : > { %1359 = vmatpush3.msra.mxu1 %v1488_v6  ;;  %v1492_v8 = vpop.eup %1491 }
 0x1c0   : > { %1360 = vmatprep.subr.mxu1 %v1581_v13  ;;  %v1494_v9 = vpop.eup %1493 }
 0x1c1   : > { %1361 = vmatpush3.msra.mxu1 %v1490_v7  ;;  %v1496_v10 = vpop.eup %1495 }
 0x1c2   : > { %1362 = vmatprep.subr.mxu1 %v1581_v13  ;;  %v1498_v12 = vpop.eup %1497 }
 0x1c3   : > { %1363 = vmatpush3.msra.mxu1 %v1492_v8  ;;  %v1583_v8 = vmov 683565275  }
 0x1c4   : > { %1364 = vmatprep.subr.mxu1 %v1581_v13 }
 0x1c5   : > { %1365 = vmatpush3.msra.mxu1 %v1494_v9 }
 0x1c6   : > { %1366 = vmatprep.subr.mxu1 %v1581_v13 }
 0x1c7   : > { %1367 = vmatpush3.msra.mxu1 %v1496_v10  ;;  %v1584_v10 = vmov 2475754826  }
 0x1c8   : > { %1368 = vmatprep.subr.mxu1 %v1581_v13 }
 0x1c9   : > { %1369 = vmatpush3.msra.mxu1 %v1498_v12  ;;  %v1585_v12 = vmov 2131351028  }
 0x1ca   : > { %1371 = vmatmul.mubr.msk.f32.vlgmr.msra.gmra.mxu1 %vm532_vm2, %v665_v11 }
 0x1cb   : > { %1373 = vmatprep.mubr.msk.f32.mxu1 %vm1582_vm0, %v1581_v13 }
 0x1ce   : > { %1374 = vmatmul.mubr.msk.f32.gmra.mxu1 %vm532_vm2, %v666_v14 }
 0x1cf   : > { %1376 = vmatprep.mubr.msk.f32.mxu1 %vm1582_vm0, %v1581_v13 }
 0x1d2   : > { %1377 = vmatmul.mubr.msk.f32.gmra.mxu1 %vm532_vm2, %v667_v15 }
 0x1d3   : > { %1379 = vmatprep.mubr.msk.f32.mxu1 %vm1582_vm0, %v1581_v13 }
 0x1d6   : > { %1380 = vmatmul.mubr.msk.f32.gmra.mxu1 %vm532_vm2, %v668_v16  ;;  %v1586_v16 = vmov 2102212464  }
 0x1d7   : > { %1382 = vmatprep.mubr.msk.f32.mxu1 %vm1582_vm0, %v1581_v13 }
 0x1da   : > { %1383 = vmatmul.mubr.msk.f32.gmra.mxu1 %vm532_vm2, %v669_v17 }
 0x1db   : > { %1385 = vmatprep.mubr.msk.f32.mxu1 %vm1582_vm0, %v1581_v13 }
 0x1de   : > { %1386 = vmatmul.mubr.msk.f32.gmra.mxu1 %vm532_vm2, %v670_v18 }
 0x1df   : > { %1388 = vmatprep.mubr.msk.f32.mxu1 %vm1582_vm0, %v1581_v13 }
 0x1e2   : > { %1389 = vmatmul.mubr.msk.f32.gmra.mxu1 %vm532_vm2, %v671_v19  ;;  %v1587_v19 = vmov 920167782  }
 0x28a   : > { %v804_v21 = vpop.f32.mrf.mxu1 }
 0x28b   : > { %v805_v48 = vadd.f32 %v804_v21, %v682_v46 }
 0x28c   : > { %v1372_v22 = vpop.f32.mrf.mxu1 }
 0x28d   : > { %v1588_v22 = vmov 1326507024  }
 0x28e   : > { %v809_v23 = vpop.f32.mrf.mxu1 }
 0x28f   : > { %v810_v45 = vadd.f32 %v809_v23, %v687_v44 }
 0x290   : > { %v1375_v24 = vpop.f32.mrf.mxu1 }
 0x292   : > { %v814_v25 = vpop.f32.mrf.mxu1 }
 0x293   : > { %v815_v43 = vadd.f32 %v814_v25, %v692_v41 }
 0x294   : > { %v1378_v26 = vpop.f32.mrf.mxu1 }
 0x296   : > { %v819_v27 = vpop.f32.mrf.mxu1 }
 0x297   : > { %v820_v42 = vadd.f32 %v819_v27, %v697_v38 }
 0x298   : > { %v1381_v13 = vpop.f32.mrf.mxu1 }
 0x29a   : > { %v824_v29 = vpop.f32.mrf.mxu1 }
 0x29b   : > { %v825_v40 = vadd.f32 %v824_v29, %v702_v33 }
 0x29c   : > { %v1384_v30 = vpop.f32.mrf.mxu1 }
 0x29e   : > { %v829_v32 = vpop.f32.mrf.mxu1 }
 0x29f   : > { %v830_v36 = vadd.f32 %v829_v32, %v707_v31 }
 0x2a0   : > { %v1387_v34 = vpop.f32.mrf.mxu1 }
 0x2a2   : > { %v834_v35 = vpop.f32.mrf.mxu1 }
 0x2a3   : > { %v835_v37 = vadd.f32 %v834_v35, %v712_v28 }
 0x2a4   : > { %v1390_v39 = vpop.f32.mrf.mxu1 }
 0x2a5   : > { %1499 = vtanh.f32 %v835_v37 }
 0x2a6   : > { %1501 = vtanh.f32 %v830_v36 }
 0x2a7   : > { %1503 = vtanh.f32 %v825_v40 }
 0x2a8   : > { %1505 = vtanh.f32 %v820_v42 }
 0x2a9   : > { %1507 = vtanh.f32 %v815_v43 }
 0x2aa   : > { %1509 = vtanh.f32 %v810_v45 }
 0x2ab   : > { %1511 = vtanh.f32 %v805_v48 }
 0x2b2   : > { %v1500_v49 = vpop.eup %1499 }
 0x2b3   : > { %1391 = vmatprep.subr.msk.mxu0 %vm554_vm1, %v1500_v49  ;;  %v1502_v50 = vpop.eup %1501 }
 0x2b4   : > { %1392 = vmatpush3.msk.msra.mxu0 %vm554_vm1, %v1500_v49  ;;  %v1504_v51 = vpop.eup %1503 }
 0x2b5   : > { %1393 = vmatprep.subr.mxu0 %v1502_v50  ;;  %v1506_v52 = vpop.eup %1505 }
 0x2b6   : > { %1394 = vmatpush3.msra.mxu0 %v1502_v50  ;;  %v1508_v53 = vpop.eup %1507 }
 0x2b7   : > { %1395 = vmatprep.subr.mxu0 %v1504_v51  ;;  %v1510_v54 = vpop.eup %1509 }
 0x2b8   : > { %1396 = vmatpush3.msra.mxu0 %v1504_v51  ;;  %v1512_v55 = vpop.eup %1511 }
 0x2b9   : > { %1397 = vmatprep.subr.mxu0 %v1506_v52 }
 0x2ba   : > { %1398 = vmatpush3.msra.mxu0 %v1506_v52 }
 0x2bb   : > { %1399 = vmatprep.subr.mxu0 %v1508_v53 }
 0x2bc   : > { %1400 = vmatpush3.msra.mxu0 %v1508_v53 }
 0x2bd   : > { %1401 = vmatprep.subr.mxu0 %v1510_v54 }
 0x2be   : > { %1402 = vmatpush3.msra.mxu0 %v1510_v54 }
 0x2bf   : > { %1403 = vmatprep.subr.mxu0 %v1512_v55 }
 0x2c0   : > { %1404 = vmatpush3.msra.mxu0 %v1512_v55 }
 0x2c1   : > { %1406 = vmatmul.mubr.msk.f32.vlgmr.msra.gmra.mxu0 %vm532_vm2, %v846_v56 }
 0x381   : > { %v1902_v57 = vpop.f32.mrf.mxu0 }
 0x383   : > { %v934_v59 = vpop.f32.mrf.mxu0 }
 0x384   : > { %v1904_v60 = vadd.f32 %v934_v59, %v852_v58 }
 0x386   : > { %v1908_v61 = vmul.f32 %v1904_v60, %v1789_v47 }
 0x388   : > { %v947_v62 = vand.u32 2139095040, %v1908_v61  ;;  %v944_v2 = vand.u32 2147483647, %v1908_v61  ;;  %vm946_vm10 = vcmp.lt.s32.totalorder %v1908_v61, 0 }
 0x38a   : > { %v948_v63 = vshrl.u32 %v947_v62, 23  ;;  %v951_v5 = vand.u32 8388607, %v944_v2  ;;  %vm945_vm11 = vcmp.le.f32.partialorder %v944_v2, 0.7853982 }
 0x38c   : > { %v1273_v0 = vadd.s32 4294967169, %v948_v63  ;;  %v952_v24 = vor.u32 8388608, %v951_v5 }
 0x38e   : > { %v954_v1 = vadd.s32 1, %v1273_v0  ;;  %v992_v37 = vshll.u32 %v952_v24, 8 }
 0x390   : > { %vm955_vm3 = vcmp.gt.s32.totalorder %v954_v1, 0 }
 0x391   : > { %v956_v3 = vsel %vm955_vm3, %v954_v1, 0  ;;  %vm1036_vm3 = vweird.f32 %v1908_v61 }
 0x392   : > { %v958_v4 = vand.u32 31, %v956_v3  ;;  %v957_v7 = vshrl.u32 %v956_v3, 5 }
 0x394   : > { %v959_v6 = vsub.s32 32, %v958_v4  ;;  %v961_v9 = vshll.u32 %v1583_v8, %v958_v4  ;;  %v964_v47 = vshll.u32 %v1584_v10, %v958_v4  ;;  %v967_v15 = vshll.u32 %v1585_v12, %v958_v4 }
 0x395   : > { %v970_v18 = vshll.u32 %v1586_v16, %v958_v4  ;;  %v973_v21 = vshll.u32 %v1587_v19, %v958_v4  ;;  %vm976_vm4 = vcmp.lt.s32.totalorder %v957_v7, 1  ;;  %vm979_vm5 = vcmp.lt.s32.totalorder %v957_v7, 4 }
 0x396   : > { %v962_v11 = vshrl.u32 %v1584_v10, %v959_v6  ;;  %v965_v14 = vshrl.u32 %v1585_v12, %v959_v6  ;;  %v968_v17 = vshrl.u32 %v1586_v16, %v959_v6  ;;  %v971_v20 = vshrl.u32 %v1587_v19, %v959_v6 }
 0x397   : > { %v974_v23 = vshrl.u32 %v1588_v22, %v959_v6  ;;  %v960_v32 = vshrl.u32 %v1583_v8, %v959_v6  ;;  %vm978_vm6 = vcmp.lt.s32.totalorder %v957_v7, 3  ;;  %vm977_vm7 = vcmp.lt.s32.totalorder %v957_v7, 2 }
 0x398   : > { %v963_v25 = vor.u32 %v962_v11, %v961_v9  ;;  %v966_v26 = vor.u32 %v965_v14, %v964_v47  ;;  %v969_v27 = vor.u32 %v968_v17, %v967_v15  ;;  %v972_v13 = vor.u32 %v971_v20, %v970_v18 }
 0x399   : > { %v975_v28 = vor.u32 %v974_v23, %v973_v21 }
 0x39a   : > { %v981_v29 = vsel %vm979_vm5, %v969_v27, 2102212464  ;;  %v984_v30 = vsel %vm976_vm4, %v963_v25, %v966_v26  ;;  %v988_v31 = vsel %vm976_vm4, %v966_v26, %v969_v27  ;;  %v985_v33 = vsel %vm979_vm5, %v972_v13, 920167782 }
 0x39b   : > { %v989_v34 = vsel %vm979_vm5, %v975_v28, 1326507024  ;;  %v986_v35 = vsel %vm978_vm6, %v969_v27, %v985_v33  ;;  %v980_v38 = vsel %vm976_vm4, %v960_v32, %v963_v25  ;;  %v982_v39 = vsel %vm978_vm6, %v966_v26, %v981_v29 }
 0x39c   : > { %v990_v36 = vsel %vm978_vm6, %v972_v13, %v989_v34  ;;  %v987_v40 = vsel %vm977_vm7, %v984_v30, %v986_v35  ;;  %v983_v46 = vsel %vm977_vm7, %v980_v38, %v982_v39  ;;  %v857_v30 = vpop.permute.xlu0 %856  ;;  %vm1170_vm4 = vcmask 1042432  }
 0x39d   : > { %v991_v41 = vsel %vm977_vm7, %v988_v31, %v990_v36  ;;  %v1917_v44 = vmul.u32.u64.low %v992_v37, %v987_v40  ;;  %v1918_v45 = vmul.u32.u64.high %v992_v37, %v987_v40, %v1917_v44  ;;  %v999_v49 = vmul.u32 %v992_v37, %v983_v46 }
 0x39e   : > { %v1914_v42 = vmul.u32.u64.low %v992_v37, %v991_v41  ;;  %v1915_v43 = vmul.u32.u64.high %v992_v37, %v991_v41, %v1914_v42  ;;  %v940_v33 = vadd.f32 %v1902_v57, %v857_v30 }
 0x39f   : > { %v1002_v48 = vadd.s32 1, %v1918_v45 }
 0x3a0   : > { %vm1001_vm8 = vc.u32 %v1915_v43, %v1917_v44  ;;  %v1000_v0 = vadd.s32 %v1917_v44, %v1915_v43 }
 0x3a1   : > { %v1003_v50 = vsel %vm1001_vm8, %v1002_v48, %v1918_v45 }
 0x3a2   : > { %v1004_v51 = vadd.s32 %v1003_v50, %v999_v49 }
 0x3a4   : > { %v1005_v52 = vadd.s32 536870912, %v1004_v51 }
 0x3a6   : > { %v1006_v53 = vshrl.u32 %v1005_v52, 30 }
 0x3a8   : > { %v1007_v54 = vshll.u32 %v1006_v53, 30  ;;  %v1030_v14 = vsub.s32 4, %v1006_v53 }
 0x3aa   : > { %v1008_v55 = vsub.s32 %v1004_v51, %v1007_v54  ;;  %v1031_v17 = vsel %vm946_vm10, %v1030_v14, %v1006_v53 }
 0x3ab   : > { %v1033_v18 = vsel %vm945_vm11, 0, %v1031_v17 }
 0x3ac   : > { %v1010_v56 = vsub.s32 0, %v1008_v55  ;;  %v1037_v19 = vadd.s32 3, %v1033_v18  ;;  %v1145_v21 = vand.u32 3, %v1033_v18 }
 0x3ae   : > { %v1274_v58 = vmin.u32 %v1010_v56, %v1008_v55  ;;  %v1038_v20 = vand.u32 3, %v1037_v19  ;;  %vm1150_vm13 = vcmp.eq.s32.totalorder %v1145_v21, 2  ;;  %vm1147_vm15 = vcmp.eq.s32.totalorder %v1145_v21, 0 }
 0x3af   : > { %vm1146_vm2 = vcmp.lt.s32.totalorder %v1145_v21, 2 }
 0x3b0   : > { %v1012_v59 = vclz %v1274_v58  ;;  %vm1043_vm12 = vcmp.eq.s32.totalorder %v1038_v20, 2  ;;  %vm1040_vm14 = vcmp.eq.s32.totalorder %v1038_v20, 0  ;;  %vm1039_vm0 = vcmp.lt.s32.totalorder %v1038_v20, 2 }
 0x3b2   : > { %v1275_v62 = vadd.s32 4294967294, %v1012_v59 }
 0x3b4   : > { %vm1276_vm9 = vcmp.lt.s32.totalorder %v1275_v62, 0 }
 0x3b5   : > { %v1015_v63 = vsel %vm1276_vm9, 0, %v1275_v62 }
 0x3b6   : > { %v1016_v1 = vsub.s32 32, %v1015_v63  ;;  %v1020_v3 = vsub.s32 4294967266, %v1015_v63  ;;  %v1017_v4 = vshll.u32 %v1008_v55, %v1015_v63 }
 0x3b8   : > { %v1018_v5 = vshrl.u32 %v1000_v0, %v1016_v1  ;;  %v1021_v6 = vadd.s32 127, %v1020_v3 }
 0x3ba   : > { %v1019_v7 = vor.u32 %v1018_v5, %v1017_v4  ;;  %v1022_v8 = vshll.u32 %v1021_v6, 23 }
 0x3bc   : > { %v1023_v9 = vor.u32 4788187, %v1022_v8  ;;  %v1026_v47 = vcvt.s32.f32 %v1019_v7 }
 0x3be   : > { %v1024_v10 = vand.u32 2147483647, %v1023_v9 }
 0x3c0   : > { %v1027_v11 = vmul.f32 %v1026_v47, %v1024_v10 }
 0x3c2   : > { %v1028_v12 = vxor.u32 2147483648, %v1027_v11 }
 0x3c4   : > { %v1029_v15 = vsel %vm946_vm10, %v1028_v12, %v1027_v11 }
 0x3c5   : > { %v1032_v16 = vsel %vm945_vm11, %v1908_v61, %v1029_v15 }
 0x3c6   : > { %1513 = vcosq.f32 %v1032_v16 }
 0x3c7   : > { %1515 = vsinq.f32 %v1032_v16 }
 0x3d3   : > { %v1514_v22 = vpop.eup %1513 }
 0x3d4   : > { %v1516_v23 = vpop.eup %1515  ;;  %v1044_v24 = vxor.u32 2147483648, %v1514_v22 }
 0x3d5   : > { %v1041_v25 = vxor.u32 2147483648, %v1516_v23 }
 0x3d6   : > { %v1045_v26 = vsel %vm1043_vm12, %v1044_v24, %v1516_v23  ;;  %v1152_v2 = vsel %vm1150_vm13, %v1044_v24, %v1516_v23 }
 0x3d7   : > { %v1042_v27 = vsel %vm1040_vm14, %v1514_v22, %v1041_v25  ;;  %v1149_v13 = vsel %vm1147_vm15, %v1514_v22, %v1041_v25 }
 0x3d8   : > { %v1046_v28 = vsel %vm1039_vm0, %v1042_v27, %v1045_v26  ;;  %v1153_v29 = vsel %vm1146_vm2, %v1149_v13, %v1152_v2 }
 0x3d9   : > { %v1047_v31 = vsel %vm1036_vm3, nan, %v1046_v28  ;;  %v1154_v32 = vsel %vm1036_vm3, nan, %v1153_v29 }
 0x3da   : > { %v1156_v34 = vrot.slane %v1154_v32, 5  ;;  %v1049_v35 = vrot.slane %v1047_v31, 3 }
 0x3dc   : > { %v1158_v36 = vmul.f32 %v1156_v34, %v1904_v60  ;;  %v1159_v37 = vmul.f32 %v1156_v34, %v940_v33  ;;  %v1051_v40 = vmul.f32 %v1049_v35, %v1904_v60 }
 0x3de   : > { %v1162_v38 = vrot.slane %v1158_v36, 6  ;;  %v1163_v39 = vrot.slane %v1159_v37, 6 }
 0x3e0   : > { %v1164_v61 = vsel %vm554_vm1, %v1162_v38, %v1163_v39 }
 0x3e1   : > { %v1166_v41 = vadd.f32 %v1164_v61, %v1051_v40 }
 0x3e3   : > { %v1168_v42 = vrot.slane %v1166_v41, 1 }
 0x3e5   : > { %v1171_v43 = vsel %vm1170_vm4, %v1168_v42, 0.0 }
 0x3e6   : > { %v1172_v44 = vrot.slane %v1171_v43, 4 }
 0x3e8   : > { %v1173_v45 = vadd.f32 %v1172_v44, %v1171_v43 }
 0x3ea   : > { %v1174_v57 = vrot.slane %v1173_v45, 2 }
 0x3ec   : > { %v1175_v46 = vadd.f32 %v1174_v57, %v1173_v45 }
 0x3ee   : > { %v1176_v48 = vrot.slane %v1175_v46, 1 }
 0x3f0   : > { %v1177_v49 = vadd.f32 %v1176_v48, %v1175_v46 }
 0x3f2   : > { %v1178_v50 = vadd.f32 %v1177_v49, %v1904_v60 }
 0x3f4   : > { %v1179_v51 = vmul.f32 0.25, %v1178_v50 }
 0x3f6   : > { %1180 = vst [vmem:[%s322_s24] sm:$0x1] %v1179_v51 }
 0x3f7   : > { %1530 = shalt.err (!%p1527_p3)
}
 0x3f8   : > { %s1531_s21 = scalar_lea.hbm %s1192_s28, 16  ;;  %s1535_s24 = scalar_lea.hbm %s1977_s9, 48 }
 0x3f9   : > { %p1532_p4 = scmp.ne.s32.totalorder %s1192_s28, %s1531_s21  ;;  %p1536_p9 = scmp.lt.s32.totalorder %s1192_s28, %s1977_s9 }
 0x3fa   : > { %p1537_p10 = scmp.lt.s32.totalorder %s1535_s24, %s1531_s21 }
 0x3fb   : > { %p1533_p7 = pnand %p1532_p4, %p1678_p5 }
 0x3fc   : > { %p1538_p11 = por %p1537_p10, %p1536_p9 }
 0x3fd   : > { %p1534_p8 = pneg %p1533_p7 }
 0x3ff   : > { %p1539_p12 = pnand %p1538_p11, %p1534_p8 }
 0x401   : > { %1542 = shalt.err (!%p1539_p12)
}
 0x402   : > { %1412 = dma.vmem_to_hbm [thread:$0]  (%p1678_p5), %s1195_s25, 16, %s1192_s28, %s1182_s29  }
 0x403 PF: > { %p1418_p13 = scmp.ge.s32.totalorder %s1577_s12, 2  ;;  %s1206_s14 = sand.u32 1, %s1565_s30  }
 0x404   : > { %s1207_s16 = scalar_lea.sflag [#allocation3], %s1206_s14 }
 0x405   : > { %p1415_p0 = pnand %p1418_p13, %p1682_p6 }
 0x407   : > { %p1416_p1 = pneg %p1415_p0 }
 0x409   : > { %1560 = dma.done.wait (%p1416_p1), %s1207_s16, 16  }
 0x40a   : > { %1562 = vsyncadd (%p1416_p1), %s1207_s16, 4294967280  ;;  %p19_p2 = scmp.ge.s32.totalorder %s1665_s15, 5   ;;  %s1980_s30 = smov %s1569_s10 }
 0x40b   : > { %s1981_s10 = smov %s1573_s11  ;;  %s1982_s11 = smov %s1676_s18 }
 0x40c   : > { %s1983_s12 = smov %s1665_s15  ;;  %21 = sbr.rel (!%p19_p2) target bundleno = 3 (0x3), region = 91 }
 0x411   :  { %1211 = vsyncpa [#allocation3], 1 }
 0x412   :  { %1213 = vsyncpa [#allocation3 + $0x1], 1 }

</bundles_post_ra>
